<compile_context>
chip_gen: v7x
topology: tpu7x:2x2x1
jax: 0.10.0
libtpu: 0.0.40
codegen_flags: <defaults>
</compile_context>

<pallas_src>
import functools

import jax
import jax.numpy as jnp
from jax.experimental import pallas as pl
from jax.experimental.pallas import tpu as pltpu


INNER_DIMENSIONALITY_FACTOR = 4


def _round_up(a, b):
    return (a + b - 1) // b * b


def _vmem_budget_bytes():
    """Scoped-VMEM limit to request, by TPU generation (conservative on v7x)."""
    try:
        kind = jax.devices()[0].device_kind.lower()
    except Exception:  # pragma: no cover - defensive
        kind = ""
    if "v7" in kind:
        return 48 * 1024 * 1024        # 64 MiB physical per TC -> leave headroom
    return 96 * 1024 * 1024            # v5e / v6e: 128 MiB physical


def _choose_tiles(M, Ep, Hp, budget):
    """Pick (tm, tk) so double-buffered working set fits `budget` bytes."""
    tm = min(512, _round_up(M, 16))
    # Guarantee >=2 row tiles when possible so the "parallel" axis can shard
    # across both v7x TensorCores (no-op on single-TC v5e/v6e).
    if M > 16 and pl.cdiv(M, tm) < 2:
        tm = _round_up(pl.cdiv(M, 2), 16)

    def fits(tm_, tk_):
        vmem = (2 * tm_ * Ep * 4        # x tile (f32), double-buffered
                + 2 * Ep * tk_ * 2      # W1 chunk (bf16)
                + 2 * tk_ * Ep * 2      # W2 chunk (bf16)
                + 2 * tm_ * Ep * 4      # output tile (f32 accumulator)
                + 2 * (tk_ + Ep) * 4)   # biases
        return vmem + (2 << 20) <= budget

    tk_candidates = [t for t in (512, 256, 128) if t <= Hp and Hp % t == 0] or [Hp]
    tk = tk_candidates[-1]
    for t in tk_candidates:
        if fits(tm, t):
            tk = t
            break
    while not fits(tm, tk) and tm > 16:
        tm = max(16, _round_up(tm // 2, 16))
    return tm, tk


def _ffn_kernel(x_ref, w1_ref, b1_ref, w2_ref, b2_ref, o_ref):
    """Grid = (row_tiles, hidden_tiles). Hidden axis reduces into the resident o_ref."""
    k = pl.program_id(1)

    @pl.when(k == 0)
    def _():
        o_ref[...] = jnp.zeros_like(o_ref)

    # First matmul (bf16 MXU operands, f32 accumulation) + bias + ReLU on this
    # hidden chunk. x is cast to bf16 in VMEM (no padded bf16 copy in HBM).
    x = x_ref[...].astype(jnp.bfloat16)                                # (tm, Ep)
    h = jnp.dot(x, w1_ref[...], preferred_element_type=jnp.float32)    # (tm, tk)
    h = jnp.maximum(h + b1_ref[...], 0.0)

    # Second matmul: partial contribution of this hidden chunk, accumulated
    # directly into the f32 output tile (resident across k).
    o_ref[...] += jnp.dot(h.astype(jnp.bfloat16), w2_ref[...],
                          preferred_element_type=jnp.float32)           # (tm, Ep)

    @pl.when(k == pl.num_programs(1) - 1)
    def _():
        # TODO(synk): dropout is identity in eval mode; training-mode dropout
        # would need pltpu.prng_seed/prng_random_bits + keep-mask and 1/(1-p).
        o_ref[...] += b2_ref[...]


def prepare_params(w1, b1, w2, b2):
    """One-time weight prep: bf16 cast + lane-aligned padding (hoisted out of calls)."""
    n_embed, d_model = w1.shape
    Ep = _round_up(n_embed, 256 if n_embed >= 256 else 128)
    Hp = _round_up(d_model, 256 if d_model >= 256 else 128)
    w1p = jnp.pad(w1.astype(jnp.bfloat16), ((0, Ep - n_embed), (0, Hp - d_model)))
    b1p = jnp.pad(b1.astype(jnp.float32).reshape(1, d_model),
                  ((0, 0), (0, Hp - d_model)))
    w2p = jnp.pad(w2.astype(jnp.bfloat16), ((0, Hp - d_model), (0, Ep - n_embed)))
    b2p = jnp.pad(b2.astype(jnp.float32).reshape(1, n_embed),
                  ((0, 0), (0, Ep - n_embed)))
    return w1p, b1p, w2p, b2p


@jax.jit
def feed_forward(x, w1p, b1p, w2p, b2p):
    """x: (batch, seq, n_embed) f32 -> (batch, seq, n_embed) f32 (eval-mode dropout)."""
    B, T, n_embed = x.shape
    Ep, Hp = w1p.shape
    M = B * T

    budget = _vmem_budget_bytes()
    tm, tk = _choose_tiles(M, Ep, Hp, budget)
    Mp = _round_up(M, tm)

    x2d = x.reshape(M, n_embed)
    if Mp != M or Ep != n_embed:
        # Zero padding keeps the math exact (padded rows/cols are sliced off).
        x2d = jnp.pad(x2d, ((0, Mp - M), (0, Ep - n_embed)))

    grid = (Mp // tm, Hp // tk)

    out2d = pl.pallas_call(
        _ffn_kernel,
        out_shape=jax.ShapeDtypeStruct((Mp, Ep), jnp.float32),
        grid=grid,
        in_specs=[
            pl.BlockSpec((tm, Ep), lambda i, k: (i, 0)),   # x row tile (f32)
            pl.BlockSpec((Ep, tk), lambda i, k: (0, k)),   # W1 hidden chunk (bf16)
            pl.BlockSpec((1, tk), lambda i, k: (0, k)),    # b1 chunk
            pl.BlockSpec((tk, Ep), lambda i, k: (k, 0)),   # W2 hidden chunk (bf16)
            pl.BlockSpec((1, Ep), lambda i, k: (0, 0)),    # b2 (resident)
        ],
        out_specs=pl.BlockSpec((tm, Ep), lambda i, k: (i, 0)),  # resident across k
        compiler_params=pltpu.CompilerParams(
            dimension_semantics=("parallel", "arbitrary"),
            vmem_limit_bytes=budget,
        ),
    )(x2d, w1p, b1p, w2p, b2p)

    return out2d[:M, :n_embed].reshape(B, T, n_embed)


def init_params(key, n_embed):
    """Deterministic init matching nn.Linear shapes (weights stored [in, out])."""
    d_model = INNER_DIMENSIONALITY_FACTOR * n_embed
    k1, k2, k3, k4 = jax.random.split(key, 4)
    bound1 = 1.0 / (n_embed ** 0.5)
    bound2 = 1.0 / (d_model ** 0.5)
    w1 = jax.random.uniform(k1, (n_embed, d_model), jnp.float32, -bound1, bound1)
    b1 = jax.random.uniform(k2, (d_model,), jnp.float32, -bound1, bound1)
    w2 = jax.random.uniform(k3, (d_model, n_embed), jnp.float32, -bound2, bound2)
    b2 = jax.random.uniform(k4, (n_embed,), jnp.float32, -bound2, bound2)
    return w1, b1, w2, b2


if __name__ == "__main__":
    key = jax.random.PRNGKey(0)
    batch, seq, n_embed = 2, 8, 32            # d_model = 4 * 32 = 128
    kx, kp = jax.random.split(key)

    x = jax.random.normal(kx, (batch, seq, n_embed), jnp.float32)
    w1, b1, w2, b2 = init_params(kp, n_embed)

    # One-time weight preparation (cast + pad) — hoisted out of the call path.
    w1p, b1p, w2p, b2p = prepare_params(w1, b1, w2, b2)

    out = feed_forward(x, w1p, b1p, w2p, b2p)
    out = jax.block_until_ready(out)

    # Pure-JAX reference with the same bf16-operand / f32-accumulation recipe
    # (eval-mode dropout == identity).
    x2d = x.reshape(-1, n_embed).astype(jnp.bfloat16)
    h_ref = jnp.maximum(
        jnp.dot(x2d, w1.astype(jnp.bfloat16), preferred_element_type=jnp.float32) + b1,
        0.0)
    ref2d = jnp.dot(h_ref.astype(jnp.bfloat16), w2.astype(jnp.bfloat16),
                    preferred_element_type=jnp.float32) + b2
    ref = ref2d.reshape(batch, seq, n_embed)

    assert out.shape == (batch, seq, n_embed)
    assert jnp.allclose(out, ref, atol=1e-3, rtol=1e-3)

    print("KERNEL_OK")
</pallas_src>

<mosaic_0001>
module attributes {stable_mosaic.version = 11 : i64} {
  func.func @_ffn_kernel(%arg0: i32, %arg1: i32, %arg2: memref<16x128xf32, #tpu.memory_space<vmem>>, %arg3: memref<128x128xbf16, #tpu.memory_space<vmem>>, %arg4: memref<1x128xf32, #tpu.memory_space<vmem>>, %arg5: memref<128x128xbf16, #tpu.memory_space<vmem>>, %arg6: memref<1x128xf32, #tpu.memory_space<vmem>>, %arg7: memref<16x128xf32, #tpu.memory_space<vmem>>) attributes {dimension_semantics = [#tpu.dimension_semantics<parallel>, #tpu.dimension_semantics<arbitrary>], iteration_bounds = array<i64: 1, 1>, scalar_prefetch = 0 : i64, scratch_operands = 0 : i64, tpu.core_type = #tpu.core_type<tc>, window_params = [{transform_indices = @transform_0, window_bounds = array<i64: 16, 128>}, {transform_indices = @transform_1, window_bounds = array<i64: 128, 128>}, {transform_indices = @transform_2, window_bounds = array<i64: 1, 128>}, {transform_indices = @transform_3, window_bounds = array<i64: 128, 128>}, {pipeline_mode = #tpu.pipeline_mode<synchronous>, transform_indices = @transform_4, window_bounds = array<i64: 1, 128>}, {transform_indices = @transform_5, window_bounds = array<i64: 16, 128>}]} {
    %c0_i32 = arith.constant 0 : i32
    %0 = arith.cmpi eq, %arg1, %c0_i32 : i32
    %1 = arith.extui %0 : i1 to i32
    %c0_i32_0 = arith.constant 0 : i32
    %2 = arith.cmpi ne, %1, %c0_i32_0 : i32
    scf.if %2 {
      %cst_16 = arith.constant 0.000000e+00 : f32
      %21 = vector.broadcast %cst_16 : f32 to vector<16x128xf32>
      %c0_17 = arith.constant 0 : index
      %c0_18 = arith.constant 0 : index
      %22 = vector.load %arg7[%c0_17, %c0_18] : memref<16x128xf32, #tpu.memory_space<vmem>>, vector<16x128xf32>
      tpu.vector_store %arg7[%c0_17, %c0_18], %21 {strides = array<i32>} : memref<16x128xf32, #tpu.memory_space<vmem>>, vector<16x128xf32>,
    } else {
    }
    %c0 = arith.constant 0 : index
    %c0_1 = arith.constant 0 : index
    %3 = vector.load %arg2[%c0, %c0_1] : memref<16x128xf32, #tpu.memory_space<vmem>>, vector<16x128xf32>
    %4 = arith.truncf %3 : vector<16x128xf32> to vector<16x128xbf16>
    %c0_2 = arith.constant 0 : index
    %c0_3 = arith.constant 0 : index
    %5 = vector.load %arg3[%c0_2, %c0_3] : memref<128x128xbf16, #tpu.memory_space<vmem>>, vector<128x128xbf16>
    %cst = arith.constant dense<0.000000e+00> : vector<16x128xf32>
    %6 = tpu.matmul %4, %5, %cst {dimension_numbers = #tpu.dot_dimension_numbers<[1], [0], [0], [1], [0, 0, 1, 1], [], []>} : vector<16x128xbf16>, vector<128x128xbf16>, vector<16x128xf32> -> vector<16x128xf32>
    %c0_4 = arith.constant 0 : index
    %c0_5 = arith.constant 0 : index
    %7 = vector.load %arg4[%c0_4, %c0_5] : memref<1x128xf32, #tpu.memory_space<vmem>>, vector<1x128xf32>
    %8 = vector.broadcast %7 : vector<1x128xf32> to vector<16x128xf32>
    %9 = arith.addf %6, %8 : vector<16x128xf32>
    %cst_6 = arith.constant 0.000000e+00 : f32
    %10 = vector.broadcast %cst_6 : f32 to vector<16x128xf32>
    %11 = arith.maximumf %9, %10 : vector<16x128xf32>
    %c0_7 = arith.constant 0 : index
    %c0_8 = arith.constant 0 : index
    %12 = vector.load %arg7[%c0_7, %c0_8] : memref<16x128xf32, #tpu.memory_space<vmem>>, vector<16x128xf32>
    %13 = arith.truncf %11 : vector<16x128xf32> to vector<16x128xbf16>
    %c0_9 = arith.constant 0 : index
    %c0_10 = arith.constant 0 : index
    %14 = vector.load %arg5[%c0_9, %c0_10] : memref<128x128xbf16, #tpu.memory_space<vmem>>, vector<128x128xbf16>
    %cst_11 = arith.constant dense<0.000000e+00> : vector<16x128xf32>
    %15 = tpu.matmul %13, %14, %cst_11 {dimension_numbers = #tpu.dot_dimension_numbers<[1], [0], [0], [1], [0, 0, 1, 1], [], []>} : vector<16x128xbf16>, vector<128x128xbf16>, vector<16x128xf32> -> vector<16x128xf32>
    %16 = arith.addf %12, %15 : vector<16x128xf32>
    %c0_12 = arith.constant 0 : index
    %c0_13 = arith.constant 0 : index
    %17 = vector.load %arg7[%c0_12, %c0_13] : memref<16x128xf32, #tpu.memory_space<vmem>>, vector<16x128xf32>
    tpu.vector_store %arg7[%c0_12, %c0_13], %16 {strides = array<i32>} : memref<16x128xf32, #tpu.memory_space<vmem>>, vector<16x128xf32>,
    %c0_i32_14 = arith.constant 0 : i32
    %18 = arith.cmpi eq, %arg1, %c0_i32_14 : i32
    %19 = arith.extui %18 : i1 to i32
    %c0_i32_15 = arith.constant 0 : i32
    %20 = arith.cmpi ne, %19, %c0_i32_15 : i32
    scf.if %20 {
      %c0_16 = arith.constant 0 : index
      %c0_17 = arith.constant 0 : index
      %21 = vector.load %arg7[%c0_16, %c0_17] : memref<16x128xf32, #tpu.memory_space<vmem>>, vector<16x128xf32>
      %c0_18 = arith.constant 0 : index
      %c0_19 = arith.constant 0 : index
      %22 = vector.load %arg6[%c0_18, %c0_19] : memref<1x128xf32, #tpu.memory_space<vmem>>, vector<1x128xf32>
      %23 = vector.broadcast %22 : vector<1x128xf32> to vector<16x128xf32>
      %24 = arith.addf %21, %23 : vector<16x128xf32>
      %c0_20 = arith.constant 0 : index
      %c0_21 = arith.constant 0 : index
      %25 = vector.load %arg7[%c0_20, %c0_21] : memref<16x128xf32, #tpu.memory_space<vmem>>, vector<16x128xf32>
      tpu.vector_store %arg7[%c0_20, %c0_21], %24 {strides = array<i32>} : memref<16x128xf32, #tpu.memory_space<vmem>>, vector<16x128xf32>,
    } else {
    }
    return
  }
  func.func @transform_0(%arg0: i32, %arg1: i32) -> (i32, i32) {
    %c0_i32 = arith.constant 0 : i32
    %c0_i32_0 = arith.constant 0 : i32
    return %arg0, %c0_i32 : i32, i32
  }
  func.func @transform_1(%arg0: i32, %arg1: i32) -> (i32, i32) {
    %c0_i32 = arith.constant 0 : i32
    %c0_i32_0 = arith.constant 0 : i32
    return %c0_i32, %arg1 : i32, i32
  }
  func.func @transform_2(%arg0: i32, %arg1: i32) -> (i32, i32) {
    %c0_i32 = arith.constant 0 : i32
    %c0_i32_0 = arith.constant 0 : i32
    return %c0_i32, %arg1 : i32, i32
  }
  func.func @transform_3(%arg0: i32, %arg1: i32) -> (i32, i32) {
    %c0_i32 = arith.constant 0 : i32
    %c0_i32_0 = arith.constant 0 : i32
    return %arg1, %c0_i32 : i32, i32
  }
  func.func @transform_4(%arg0: i32, %arg1: i32) -> (i32, i32) {
    %c0_i32 = arith.constant 0 : i32
    %c0_i32_0 = arith.constant 0 : i32
    %c0_i32_1 = arith.constant 0 : i32
    return %c0_i32, %c0_i32_0 : i32, i32
  }
  func.func @transform_5(%arg0: i32, %arg1: i32) -> (i32, i32) {
    %c0_i32 = arith.constant 0 : i32
    %c0_i32_0 = arith.constant 0 : i32
    return %arg0, %c0_i32 : i32, i32
  }
}

</mosaic_0001>

<bundles_post_ra>
// kernel: feed_forward.1
= control target key start
LH: loop header
LB: loop body
LE: loop exit
PB: predicated region body
PF: predicated region fallthrough
CT: control target
= control target key end

     0   :  { %10 = vsyncpa [#allocation3], 0  ;;  %s720_s0 = inlined_call_operand.hbm [shape: f32[16,128], index: 0, kind: input, shape index: {}]   ;;  %s721_s1 = inlined_call_operand.hbm [shape: bf16[128,128], index: 1, kind: input, shape index: {}]   ;;  %s722_s2 = inlined_call_operand.hbm [shape: f32[1,128], index: 2, kind: input, shape index: {}]   ;;  %s723_s3 = inlined_call_operand.hbm [shape: bf16[128,128], index: 3, kind: input, shape index: {}]   ;;  %s724_s4 = inlined_call_operand.hbm [shape: f32[1,128], index: 4, kind: input, shape index: {}]   ;;  %s725_s5 = inlined_call_operand.hbm [shape: f32[16,128], index: 5, kind: output, shape index: {}]  }
   0x1   :  { %11 = vsyncpa [#allocation6], 0 }
   0x2   :  { %12 = vsyncpa [#allocation9], 0 }
   0x3   :  { %13 = vsyncpa [#allocation4], 0  ;;  %s600_s18 = smov [#allocation5]   ;;  %s460_s22 = scalar_lea.hbm %s721_s1, 1024 }
   0x4   :  { %s31_s19 = sshll.u32 %s600_s18, 4  ;;  %p461_p0 = scmp.ne.s32.totalorder %s721_s1, %s460_s22  ;;  %s32_s19 = int_to_ptr.vmem [resolvable:$true] %s31_s19 }
   0x5   :  { %p464_p1 = scmp.lt.u32.totalorder %s460_s22, %s721_s1 }
   0x7   :  { %p466_p2 = pnand %p464_p1, %p461_p0 }
   0x9   :  { %469 = shalt.err (!%p466_p2)
}
   0xa   :  { %s470_s27 = scalar_lea.vmem %s32_s19, 1024  ;;  %p475_p4 = scmp.lt.s32.totalorder %s32_s19, %s32_s19 }
   0xb   :  { %p471_p3 = scmp.ne.s32.totalorder %s32_s19, %s470_s27  ;;  %p476_p5 = scmp.lt.s32.totalorder %s470_s27, %s470_s27 }
   0xd   :  { %p477_p6 = por %p476_p5, %p475_p4 }
   0xf   :  { %p478_p7 = pnand %p477_p6, %p471_p3 }
  0x11   :  { %481 = shalt.err (!%p478_p7)
}
  0x12   :  { %s601_s28 = smov 64   ;;  %s602_s29 = smov 4  }
  0x13   :  { %37 = dma.hbm_to_vmem [thread:$0]  %s721_s1, 1024, %s32_s19, [#allocation6], %s601_s28, %s601_s28, %s602_s29  }
  0x14   :  { %s603_s7 = smov [#allocation8]   ;;  %s604_s9 = smov [#allocation2]  }
  0x15   :  { %s53_s8 = sshll.u32 %s603_s7, 4  ;;  %s19_s10 = sshll.u32 %s604_s9, 4  ;;  %s54_s8 = int_to_ptr.vmem [resolvable:$true] %s53_s8  ;;  %s20_s10 = int_to_ptr.vmem [resolvable:$true] %s19_s10 }
  0x16   :  { %s482_s13 = scalar_lea.hbm %s723_s3, 1024 }
  0x17   :  { %p483_p8 = scmp.ne.s32.totalorder %s723_s3, %s482_s13  ;;  %p486_p9 = scmp.lt.u32.totalorder %s482_s13, %s723_s3 }
  0x19   :  { %p488_p10 = pnand %p486_p9, %p483_p8 }
  0x1b   :  { %491 = shalt.err (!%p488_p10)
}
  0x1c   :  { %s492_s1 = scalar_lea.vmem %s54_s8, 1024  ;;  %p497_p12 = scmp.lt.s32.totalorder %s54_s8, %s54_s8 }
  0x1d   :  { %p493_p11 = scmp.ne.s32.totalorder %s54_s8, %s492_s1  ;;  %p498_p13 = scmp.lt.s32.totalorder %s492_s1, %s492_s1 }
  0x1f   :  { %p499_p0 = por %p498_p13, %p497_p12 }
  0x21   :  { %p500_p1 = pnand %p499_p0, %p493_p11 }
  0x23   :  { %503 = shalt.err (!%p500_p1)
}
  0x24   :  { %59 = dma.hbm_to_vmem [thread:$0]  %s723_s3, 1024, %s54_s8, [#allocation9], %s601_s28, %s601_s28, %s602_s29  }
  0x25   :  { %s504_s22 = scalar_lea.hbm %s720_s0, 256 }
  0x26   :  { %p505_p2 = scmp.ne.s32.totalorder %s720_s0, %s504_s22  ;;  %p508_p3 = scmp.lt.u32.totalorder %s504_s22, %s720_s0 }
  0x28   :  { %p510_p4 = pnand %p508_p3, %p505_p2 }
  0x2a   :  { %513 = shalt.err (!%p510_p4)
}
  0x2b   :  { %s514_s27 = scalar_lea.vmem %s20_s10, 256  ;;  %p519_p6 = scmp.lt.s32.totalorder %s20_s10, %s20_s10 }
  0x2c   :  { %p515_p5 = scmp.ne.s32.totalorder %s20_s10, %s514_s27  ;;  %p520_p7 = scmp.lt.s32.totalorder %s514_s27, %s514_s27 }
  0x2e   :  { %p521_p8 = por %p520_p7, %p519_p6 }
  0x30   :  { %p522_p9 = pnand %p521_p8, %p515_p5 }
  0x32   :  { %525 = shalt.err (!%p522_p9)
}
  0x33   :  { %s605_s3 = smov 128   ;;  %s606_s28 = smov 8  }
  0x34   :  { %25 = dma.hbm_to_vmem [thread:$0]  %s720_s0, 256, %s20_s10, [#allocation3], %s605_s3, %s605_s3, %s606_s28  }
  0x35   :  { %s607_s6 = smov [#allocation7]   ;;  %s608_s8 = smov [#allocation10]  }
  0x36   :  { %s44_s7 = sshll.u32 %s607_s6, 4  ;;  %s66_s9 = sshll.u32 %s608_s8, 4  ;;  %s45_s7 = int_to_ptr.vmem [resolvable:$true] %s44_s7  ;;  %s67_s9 = int_to_ptr.vmem [resolvable:$true] %s66_s9 }
  0x37   :  { %s526_s13 = scalar_lea.hbm %s722_s2, 16 }
  0x38   :  { %p527_p10 = scmp.ne.s32.totalorder %s722_s2, %s526_s13  ;;  %p530_p11 = scmp.lt.u32.totalorder %s526_s13, %s722_s2 }
  0x3a   :  { %p532_p12 = pnand %p530_p11, %p527_p10 }
  0x3c   :  { %535 = shalt.err (!%p532_p12)
}
  0x3d   :  { %s536_s0 = scalar_lea.vmem %s45_s7, 16  ;;  %s540_s10 = scalar_lea.vmem %s45_s7, 32 }
  0x3e   :  { %p537_p13 = scmp.ne.s32.totalorder %s45_s7, %s536_s0  ;;  %p541_p0 = scmp.lt.s32.totalorder %s45_s7, %s45_s7 }
  0x3f   :  { %p542_p1 = scmp.lt.s32.totalorder %s540_s10, %s536_s0 }
  0x41   :  { %p543_p2 = por %p542_p1, %p541_p0 }
  0x43   :  { %p544_p3 = pnand %p543_p2, %p537_p13 }
  0x45   :  { %547 = shalt.err (!%p544_p3)
}
  0x46   :  { %47 = dma.hbm_to_vmem [thread:$0]  %s722_s2, 16, %s45_s7, [#allocation6]  }
  0x47   :  { %s548_s21 = scalar_lea.hbm %s724_s4, 16 }
  0x48   :  { %p549_p4 = scmp.ne.s32.totalorder %s724_s4, %s548_s21  ;;  %p552_p5 = scmp.lt.u32.totalorder %s548_s21, %s724_s4 }
  0x4a   :  { %p554_p6 = pnand %p552_p5, %p549_p4 }
  0x4c   :  { %557 = shalt.err (!%p554_p6)
}
  0x4d   :  { %s558_s26 = scalar_lea.vmem %s67_s9, 16  ;;  %s562_s27 = scalar_lea.vmem %s67_s9, 32 }
  0x4e   :  { %p559_p7 = scmp.ne.s32.totalorder %s67_s9, %s558_s26  ;;  %p563_p8 = scmp.lt.s32.totalorder %s67_s9, %s67_s9 }
  0x4f   :  { %p564_p9 = scmp.lt.s32.totalorder %s562_s27, %s558_s26 }
  0x51   :  { %p565_p10 = por %p564_p9, %p563_p8 }
  0x53   :  { %p566_p11 = pnand %p565_p10, %p559_p7 }
  0x55   :  { %569 = shalt.err (!%p566_p11)
}
  0x56   :  { %69 = dma.hbm_to_vmem [thread:$0]  %s724_s4, 16, %s67_s9, [#allocation9]  }
  0x57   :  { %592 = dma.done.wait [#allocation3], 256  }
  0x58   :  { %593 = vsyncadd [#allocation3], 4294967040 }
  0x59   :  { %594 = dma.done.wait [#allocation6], 1040  }
  0x5a   :  { %595 = vsyncadd [#allocation6], 4294966256 }
  0x5b   :  { %596 = dma.done.wait [#allocation9], 1040  }
  0x5c   :  { %597 = vsyncadd [#allocation9], 4294966256  ;;  %v609_v0 = vmov 0.0   ;;  %vm610_vm0 = vmmov 0   ;;  %v444_v1 = vld [vmem:[#allocation5] sm:$0xff]   ;;  %v445_v2 = vld [vmem:[#allocation5 + $0x8] sm:$0xff]  }
  0x5d   :  { %392 = vmatprep.subr.bf16.mxu0 %v609_v0  ;;  %408 = vmatprep.mubr.msk.bf16.mxu0 %vm610_vm0, %v609_v0  ;;  %v446_v3 = vld [vmem:[#allocation5 + $0x10] sm:$0xff]   ;;  %v452_v4 = vld [vmem:[#allocation8] sm:$0xff]   ;;  %v447_v5 = vld [vmem:[#allocation5 + $0x18] sm:$0xff]   ;;  %s611_s4 = smov [#allocation11]  }
  0x5e   :  { %412 = vmatprep.subr.bf16.mxu1 %v609_v0  ;;  %428 = vmatprep.mubr.msk.bf16.mxu1 %vm610_vm0, %v609_v0  ;;  %v453_v6 = vld [vmem:[#allocation8 + $0x8] sm:$0xff]   ;;  %v448_v7 = vld [vmem:[#allocation5 + $0x20] sm:$0xff]   ;;  %v454_v8 = vld [vmem:[#allocation8 + $0x10] sm:$0xff]   ;;  %s342_s30 = sshll.u32 %s611_s4, 4  ;;  %s343_s30 = int_to_ptr.vmem [resolvable:$true] %s342_s30 }
  0x5f   :  { %393 = vmatpush3.bf16.msra.mxu0 %v444_v1  ;;  %413 = vmatpush3.bf16.msra.mxu1 %v452_v4  ;;  %v449_v9 = vld [vmem:[#allocation5 + $0x28] sm:$0xff]   ;;  %v455_v10 = vld [vmem:[#allocation8 + $0x18] sm:$0xff]   ;;  %v450_v11 = vld [vmem:[#allocation5 + $0x30] sm:$0xff]   ;;  %s570_s6 = scalar_lea.vmem %s343_s30, 256  ;;  %p575_p13 = scmp.lt.s32.totalorder %s343_s30, %s343_s30 }
  0x60   :  { %394 = vmatprep.subr.bf16.mxu0 %v609_v0  ;;  %414 = vmatprep.subr.bf16.mxu1 %v609_v0  ;;  %v456_v12 = vld [vmem:[#allocation8 + $0x20] sm:$0xff]   ;;  %v451_v13 = vld [vmem:[#allocation5 + $0x38] sm:$0xff]   ;;  %v92_v14 = vld [vmem:[#allocation2] sm:$0xff]  ;;  %p571_p12 = scmp.ne.s32.totalorder %s343_s30, %s570_s6  ;;  %p576_p0 = scmp.lt.s32.totalorder %s570_s6, %s570_s6 }
  0x61   :  { %v93_v15 = vld [vmem:[#allocation2 + $0x8] sm:$0xff]  ;;  %v457_v16 = vld [vmem:[#allocation8 + $0x28] sm:$0xff]   ;;  %v356_v20 = vld [vmem:[#allocation7] ss:$0 sm:$0xff] }
  0x62   :  { %v94_v17 = vpack.c.bf16 %v93_v15, %v92_v14  ;;  %v458_v18 = vld [vmem:[#allocation8 + $0x30] sm:$0xff]   ;;  %v459_v19 = vld [vmem:[#allocation8 + $0x38] sm:$0xff]   ;;  %v373_v31 = vld [vmem:[#allocation10] ss:$0 sm:$0xff]  ;;  %p577_p1 = por %p576_p0, %p575_p13 }
  0x63   :  { %395 = vmatpush3.bf16.msra.mxu0 %v445_v2  ;;  %415 = vmatpush3.bf16.msra.mxu1 %v453_v6 }
  0x64   :  { %396 = vmatprep.subr.bf16.mxu0 %v609_v0  ;;  %416 = vmatprep.subr.bf16.mxu1 %v609_v0  ;;  %p578_p2 = pnand %p577_p1, %p571_p12 }
  0x67   :  { %397 = vmatpush3.bf16.msra.mxu0 %v446_v3  ;;  %417 = vmatpush3.bf16.msra.mxu1 %v454_v8 }
  0x68   :  { %398 = vmatprep.subr.bf16.mxu0 %v609_v0  ;;  %418 = vmatprep.subr.bf16.mxu1 %v609_v0 }
  0x6b   :  { %399 = vmatpush3.bf16.msra.mxu0 %v447_v5  ;;  %419 = vmatpush3.bf16.msra.mxu1 %v455_v10 }
  0x6c   :  { %400 = vmatprep.subr.bf16.mxu0 %v609_v0  ;;  %420 = vmatprep.subr.bf16.mxu1 %v609_v0 }
  0x6f   :  { %401 = vmatpush3.bf16.msra.mxu0 %v448_v7  ;;  %421 = vmatpush3.bf16.msra.mxu1 %v456_v12 }
  0x70   :  { %402 = vmatprep.subr.bf16.mxu0 %v609_v0  ;;  %422 = vmatprep.subr.bf16.mxu1 %v609_v0 }
  0x73   :  { %403 = vmatpush3.bf16.msra.mxu0 %v449_v9  ;;  %423 = vmatpush3.bf16.msra.mxu1 %v457_v16 }
  0x74   :  { %404 = vmatprep.subr.bf16.mxu0 %v609_v0  ;;  %424 = vmatprep.subr.bf16.mxu1 %v609_v0 }
  0x77   :  { %405 = vmatpush3.bf16.msra.mxu0 %v450_v11  ;;  %425 = vmatpush3.bf16.msra.mxu1 %v458_v18 }
  0x78   :  { %406 = vmatprep.subr.bf16.mxu0 %v609_v0  ;;  %426 = vmatprep.subr.bf16.mxu1 %v609_v0 }
  0x7b   :  { %407 = vmatpush3.bf16.msra.mxu0 %v451_v13  ;;  %427 = vmatpush3.bf16.msra.mxu1 %v459_v19 }
  0x7e   :  { %409 = vmatmul.mubr.bf16.vlgmr.msra.gmra.mrb[0].mxu0 %v94_v17 }
 0x151   :  { %v200_v21 = vpop.f32.mrb[0].mxu0 }
 0x152   :  { %v201_v22 = vadd.f32 %v356_v20, %v200_v21  ;;  %v410_v23 = vpop.f32.mrb[1].mxu0 }
 0x153   :  { %v203_v24 = vpop.f32.mrb[2].mxu0 }
 0x154   :  { %v204_v25 = vadd.f32 %v356_v20, %v203_v24  ;;  %v411_v26 = vpop.f32.mrb[3].mxu0  ;;  %v207_v27 = vmax.f32 %v201_v22, 0.0 }
 0x156   :  { %v208_v28 = vmax.f32 %v204_v25, 0.0 }
 0x158   :  { %v211_v29 = vpack.c.bf16 %v208_v28, %v207_v27 }
 0x15a   :  { %429 = vmatmul.mubr.bf16.vlgmr.msra.gmra.mrb[0].mxu1 %v211_v29 }
 0x22d   :  { %v310_v30 = vpop.f32.mrb[0].mxu1 }
 0x22e   :  { %v430_v32 = vpop.f32.mrb[1].mxu1  ;;  %v333_v35 = vadd.f32 %v373_v31, %v310_v30 }
 0x22f   :  { %v313_v33 = vpop.f32.mrb[2].mxu1 }
 0x230   :  { %v431_v34 = vpop.f32.mrb[3].mxu1  ;;  %v334_v36 = vadd.f32 %v373_v31, %v313_v33  ;;  %335 = vst [vmem:[#allocation11] sm:$0xff] %v333_v35 }
 0x232   :  { %336 = vst [vmem:[#allocation11 + $0x8] sm:$0xff] %v334_v36 }
 0x233   :  { %581 = shalt.err (!%p578_p2)
}
 0x234   :  { %s582_s9 = scalar_lea.hbm %s725_s5, 256 }
 0x235   :  { %p583_p3 = scmp.ne.s32.totalorder %s725_s5, %s582_s9  ;;  %p586_p4 = scmp.lt.u32.totalorder %s582_s9, %s725_s5 }
 0x237   :  { %p588_p5 = pnand %p586_p4, %p583_p3 }
 0x239   :  { %591 = shalt.err (!%p588_p5)
}
 0x23a   :  { %348 = dma.vmem_to_hbm [thread:$0]  %s343_s30, 256, %s725_s5, [#allocation4], %s605_s3, %s605_s3, %s606_s28  }
 0x23b   :  { %598 = dma.done.wait [#allocation4], 256  }
 0x23c   :  { %599 = vsyncadd [#allocation4], 4294967040 }
 0x23d   :  { %352 = vsyncpa [#allocation3], 1 }
 0x23e   :  { %353 = vsyncpa [#allocation6], 1 }
 0x23f   :  { %354 = vsyncpa [#allocation9], 1 }
 0x240   :  { %355 = vsyncpa [#allocation4], 1 }

</bundles_post_ra>
